<compile_context>
chip_gen: v7x
topology: tpu7x:2x2x1
jax: 0.10.0
libtpu: 0.0.40
codegen_flags: <defaults>
</compile_context>

<pallas_src>
import numpy as np
import jax
import jax.numpy as jnp
from jax import lax
from jax.experimental import pallas as pl
from jax.experimental.pallas import tpu as pltpu

# --------------------------------------------------------------------------
# Model hyper-parameters (small, consistent with the module's __init__)
# --------------------------------------------------------------------------
B = 2               # batch
L = 16              # sequence length
EMB_DIM = 32        # model_pars['emb_dim']
EMB_SIZE = 100      # model_pars['emb_size'] (vocab)
DIM_CHANNEL = 8     # model_pars['dim_channel']
KERNEL_WINS = (3, 4, 5)   # model_pars['kernel_height']
NUM_CLASS = 4       # model_pars['num_class']

MAXW = max(KERNEL_WINS)
K = len(KERNEL_WINS)
KC = K * DIM_CHANNEL            # concatenated feature width (24)
T_PAD = 16                      # conv time positions computed (multiple of 8)
L_PAD = T_PAD + MAXW - 1        # sentinel-padded token length per batch row (20)
V_PAD = 128                     # vocab padded to one full MXU K-pass / lane width
BT = B * T_PAD                  # matmul rows (32)
MATMUL_DTYPE = jnp.bfloat16     # MXU operand dtype; f32 accumulation
NEG_INF = np.float32(-1e30)     # additive time-mask value


# --------------------------------------------------------------------------
# Pallas kernel: one-hot (gather-free) embed+conv matmuls + masked max-pool + fc
# --------------------------------------------------------------------------
def textcnn_kernel(tok_ref,      # VMEM (MAXW*BT, 1) int32   host-shifted tokens, -1 sentinel past L
                   wfold_ref,    # VMEM (MAXW*V_PAD, KC) bf16  embed-table folded into conv weights
                   mask_ref,     # VMEM (BT, KC) f32          0 where valid, -1e30 where padded
                   bconv_ref,    # VMEM (1, KC) f32           concatenated conv biases
                   wfc_ref,      # VMEM (KC, NUM_CLASS) f32
                   bfc_ref,      # VMEM (1, NUM_CLASS) f32
                   out_ref):     # VMEM (B, NUM_CLASS) f32
    lane_iota = lax.broadcasted_iota(jnp.int32, (BT, V_PAD), 1)

    # Embedding lookup + every conv width == MAXW accumulating one-hot MXU matmuls (K=128).
    acc = jnp.zeros((BT, KC), jnp.float32)
    for i in range(MAXW):                                       # unrolled, 5 iterations
        tok_i = tok_ref[pl.ds(i * BT, BT), :]                   # (BT, 1) int32, tile-aligned slice
        onehot = (tok_i == lane_iota).astype(MATMUL_DTYPE)      # (BT, V_PAD); sentinel -> all-zero row
        w_i = wfold_ref[pl.ds(i * V_PAD, V_PAD), :]             # (V_PAD, KC) bf16
        acc = acc + jnp.dot(onehot, w_i,
                            preferred_element_type=jnp.float32)  # MXU, f32 accumulation

    # Mask padded / invalid time positions, then max-pool over time per batch row.
    masked = acc + mask_ref[...]                                # (BT, KC)
    pooled = jnp.max(masked.reshape(B, T_PAD, KC), axis=1)      # (B, KC) concatenated features
    feat = pooled + bconv_ref[...]                              # bias is time-invariant => add after max

    # TODO(synk): nn.Dropout omitted — identity in eval/inference mode.
    logits = jnp.dot(feat, wfc_ref[...],
                     preferred_element_type=jnp.float32) + bfc_ref[...]
    out_ref[...] = logits.astype(out_ref.dtype)                 # (B, NUM_CLASS)


# --------------------------------------------------------------------------
# One-time host-side packing of parameters (outside the hot path)
# --------------------------------------------------------------------------
def pack_params(params):
    table = np.zeros((V_PAD, EMB_DIM), np.float32)
    table[:EMB_SIZE] = np.asarray(params['embed'], np.float32)

    wfold = np.zeros((MAXW, V_PAD, KC), np.float32)   # offset-i folded weight, zero for i >= w
    bconv = np.zeros((1, KC), np.float32)
    mask_t = np.zeros((T_PAD, KC), np.float32)
    for k, w in enumerate(KERNEL_WINS):
        c0, c1 = k * DIM_CHANNEL, (k + 1) * DIM_CHANNEL
        cw = np.asarray(params[f'conv{w}_w'], np.float32)        # (w, D, C)
        for i in range(w):
            wfold[i, :, c0:c1] = table @ cw[i]                   # fold embedding into conv weight
        bconv[:, c0:c1] = np.asarray(params[f'conv{w}_b'], np.float32)
        mask_t[L - w + 1:, c0:c1] = NEG_INF                      # positions past this width's valid range
    mask = np.tile(mask_t, (B, 1))                               # (BT, KC)

    return dict(
        wfold=jnp.asarray(wfold.reshape(MAXW * V_PAD, KC), dtype=MATMUL_DTYPE),
        mask=jnp.asarray(mask),
        bconv=jnp.asarray(bconv),
        wfc=jnp.asarray(params['fc_w'], dtype=jnp.float32),      # (KC, NUM_CLASS)
        bfc=jnp.asarray(params['fc_b'], dtype=jnp.float32),      # (1, NUM_CLASS)
    )


# --------------------------------------------------------------------------
# Wrapper: trivial host-side token shifting + a single grid-less pallas_call
# --------------------------------------------------------------------------
def prep_tokens(tokens):
    """(B, L) int32 -> (MAXW*BT, 1) int32, time-shifted per conv offset, -1 sentinel past L."""
    tok_pad = jnp.concatenate(
        [tokens.astype(jnp.int32),
         jnp.full((B, L_PAD - L), -1, jnp.int32)], axis=1)       # (B, L_PAD)
    shifted = jnp.stack([tok_pad[:, i:i + T_PAD] for i in range(MAXW)], axis=0)  # (MAXW, B, T_PAD)
    return shifted.reshape(MAXW * BT, 1)


def textcnn_forward(tokens, packed):
    tok_col = prep_tokens(tokens)
    vmem = pl.BlockSpec(memory_space=pltpu.MemorySpace.VMEM)
    return pl.pallas_call(
        textcnn_kernel,
        out_shape=jax.ShapeDtypeStruct((B, NUM_CLASS), jnp.float32),
        in_specs=[vmem] * 6,
        out_specs=vmem,
    )(tok_col, packed['wfold'], packed['mask'], packed['bconv'],
      packed['wfc'], packed['bfc'])


# --------------------------------------------------------------------------
# Deterministic parameter init (synthetic; shapes match the nn.Module)
# --------------------------------------------------------------------------
def init_params(key):
    keys = jax.random.split(key, 3 + 2 * len(KERNEL_WINS) + 2)
    params = {}
    params['embed'] = jax.random.normal(keys[0], (EMB_SIZE, EMB_DIM), jnp.float32) * 0.1
    ki = 1
    for w in KERNEL_WINS:
        # PyTorch Conv2d weight is (C, 1, w, D); stored transposed as (w, D, C)
        params[f'conv{w}_w'] = jax.random.normal(
            keys[ki], (w, EMB_DIM, DIM_CHANNEL), jnp.float32) * 0.05
        params[f'conv{w}_b'] = jax.random.normal(
            keys[ki + 1], (1, DIM_CHANNEL), jnp.float32) * 0.05
        ki += 2
    # PyTorch Linear weight is (num_class, K*C); stored transposed as (K*C, num_class)
    params['fc_w'] = jax.random.normal(keys[ki], (KC, NUM_CLASS), jnp.float32) * 0.05
    params['fc_b'] = jax.random.normal(keys[ki + 1], (1, NUM_CLASS), jnp.float32) * 0.05
    return params


# --------------------------------------------------------------------------
# Pure-JAX reference (f32) for a correctness sanity check
# --------------------------------------------------------------------------
def textcnn_reference(tokens, params):
    emb = params['embed'][tokens]                                # (B, L, D)
    pooled = []
    for w in KERNEL_WINS:
        W = params[f'conv{w}_w']                                 # (w, D, C)
        bias = params[f'conv{w}_b']                              # (1, C)
        lout = L - w + 1
        conv = jnp.stack(
            [jnp.einsum('bwd,wdc->bc', emb[:, t:t + w, :], W) for t in range(lout)],
            axis=1) + bias[:, None, :]                           # (B, lout, C)
        pooled.append(jnp.max(conv, axis=1))                     # (B, C)
    feat = jnp.concatenate(pooled, axis=-1)                      # (B, K*C)
    return feat @ params['fc_w'] + params['fc_b']                # (B, NUM_CLASS)


if __name__ == "__main__":
    key = jax.random.PRNGKey(0)
    k_tok, k_par = jax.random.split(key)
    tokens = jax.random.randint(k_tok, (B, L), 0, EMB_SIZE, dtype=jnp.int32)
    params = init_params(k_par)
    packed = pack_params(params)

    logits = textcnn_forward(tokens, packed)
    jax.block_until_ready(logits)
    assert logits.shape == (B, NUM_CLASS)

    ref = textcnn_reference(tokens, params)
    np.testing.assert_allclose(np.asarray(logits), np.asarray(ref), rtol=5e-2, atol=1e-2)
    print("KERNEL_OK")
</pallas_src>

<mosaic_0001>
module attributes {stable_mosaic.version = 11 : i64} {
  func.func @textcnn_kernel(%arg0: memref<160x1xi32, #tpu.memory_space<vmem>>, %arg1: memref<640x24xbf16, #tpu.memory_space<vmem>>, %arg2: memref<32x24xf32, #tpu.memory_space<vmem>>, %arg3: memref<1x24xf32, #tpu.memory_space<vmem>>, %arg4: memref<24x4xf32, #tpu.memory_space<vmem>>, %arg5: memref<1x4xf32, #tpu.memory_space<vmem>>, %arg6: memref<2x4xf32, #tpu.memory_space<vmem>>) attributes {dimension_semantics = [], scalar_prefetch = 0 : i64, scratch_operands = 0 : i64, tpu.core_type = #tpu.core_type<tc>} {
    %0 = tpu.iota {dimensions = array<i32: 1>} : vector<32x128xi32>
    %cst = arith.constant 0.000000e+00 : f32
    %1 = vector.broadcast %cst : f32 to vector<32x24xf32>
    %c0 = arith.constant 0 : index
    %c0_0 = arith.constant 0 : index
    %2 = vector.load %arg0[%c0, %c0_0] : memref<160x1xi32, #tpu.memory_space<vmem>>, vector<32x1xi32>
    %3 = vector.broadcast %2 : vector<32x1xi32> to vector<32x128xi32>
    %4 = arith.cmpi eq, %3, %0 : vector<32x128xi32>
    %5 = arith.extui %4 : vector<32x128xi1> to vector<32x128xi32>
    %6 = arith.sitofp %5 : vector<32x128xi32> to vector<32x128xf32>
    %7 = arith.truncf %6 : vector<32x128xf32> to vector<32x128xbf16>
    %c0_1 = arith.constant 0 : index
    %c0_2 = arith.constant 0 : index
    %8 = vector.load %arg1[%c0_1, %c0_2] : memref<640x24xbf16, #tpu.memory_space<vmem>>, vector<128x24xbf16>
    %cst_3 = arith.constant dense<0.000000e+00> : vector<32x24xf32>
    %9 = tpu.matmul %7, %8, %cst_3 {dimension_numbers = #tpu.dot_dimension_numbers<[1], [0], [0], [1], [0, 0, 1, 1], [], []>} : vector<32x128xbf16>, vector<128x24xbf16>, vector<32x24xf32> -> vector<32x24xf32>
    %10 = arith.addf %1, %9 : vector<32x24xf32>
    %c32 = arith.constant 32 : index
    %c0_4 = arith.constant 0 : index
    %11 = vector.load %arg0[%c32, %c0_4] : memref<160x1xi32, #tpu.memory_space<vmem>>, vector<32x1xi32>
    %12 = vector.broadcast %11 : vector<32x1xi32> to vector<32x128xi32>
    %13 = arith.cmpi eq, %12, %0 : vector<32x128xi32>
    %14 = arith.extui %13 : vector<32x128xi1> to vector<32x128xi32>
    %15 = arith.sitofp %14 : vector<32x128xi32> to vector<32x128xf32>
    %16 = arith.truncf %15 : vector<32x128xf32> to vector<32x128xbf16>
    %c128 = arith.constant 128 : index
    %c0_5 = arith.constant 0 : index
    %17 = vector.load %arg1[%c128, %c0_5] : memref<640x24xbf16, #tpu.memory_space<vmem>>, vector<128x24xbf16>
    %cst_6 = arith.constant dense<0.000000e+00> : vector<32x24xf32>
    %18 = tpu.matmul %16, %17, %cst_6 {dimension_numbers = #tpu.dot_dimension_numbers<[1], [0], [0], [1], [0, 0, 1, 1], [], []>} : vector<32x128xbf16>, vector<128x24xbf16>, vector<32x24xf32> -> vector<32x24xf32>
    %19 = arith.addf %10, %18 : vector<32x24xf32>
    %c64 = arith.constant 64 : index
    %c0_7 = arith.constant 0 : index
    %20 = vector.load %arg0[%c64, %c0_7] : memref<160x1xi32, #tpu.memory_space<vmem>>, vector<32x1xi32>
    %21 = vector.broadcast %20 : vector<32x1xi32> to vector<32x128xi32>
    %22 = arith.cmpi eq, %21, %0 : vector<32x128xi32>
    %23 = arith.extui %22 : vector<32x128xi1> to vector<32x128xi32>
    %24 = arith.sitofp %23 : vector<32x128xi32> to vector<32x128xf32>
    %25 = arith.truncf %24 : vector<32x128xf32> to vector<32x128xbf16>
    %c256 = arith.constant 256 : index
    %c0_8 = arith.constant 0 : index
    %26 = vector.load %arg1[%c256, %c0_8] : memref<640x24xbf16, #tpu.memory_space<vmem>>, vector<128x24xbf16>
    %cst_9 = arith.constant dense<0.000000e+00> : vector<32x24xf32>
    %27 = tpu.matmul %25, %26, %cst_9 {dimension_numbers = #tpu.dot_dimension_numbers<[1], [0], [0], [1], [0, 0, 1, 1], [], []>} : vector<32x128xbf16>, vector<128x24xbf16>, vector<32x24xf32> -> vector<32x24xf32>
    %28 = arith.addf %19, %27 : vector<32x24xf32>
    %c96 = arith.constant 96 : index
    %c0_10 = arith.constant 0 : index
    %29 = vector.load %arg0[%c96, %c0_10] : memref<160x1xi32, #tpu.memory_space<vmem>>, vector<32x1xi32>
    %30 = vector.broadcast %29 : vector<32x1xi32> to vector<32x128xi32>
    %31 = arith.cmpi eq, %30, %0 : vector<32x128xi32>
    %32 = arith.extui %31 : vector<32x128xi1> to vector<32x128xi32>
    %33 = arith.sitofp %32 : vector<32x128xi32> to vector<32x128xf32>
    %34 = arith.truncf %33 : vector<32x128xf32> to vector<32x128xbf16>
    %c384 = arith.constant 384 : index
    %c0_11 = arith.constant 0 : index
    %35 = vector.load %arg1[%c384, %c0_11] : memref<640x24xbf16, #tpu.memory_space<vmem>>, vector<128x24xbf16>
    %cst_12 = arith.constant dense<0.000000e+00> : vector<32x24xf32>
    %36 = tpu.matmul %34, %35, %cst_12 {dimension_numbers = #tpu.dot_dimension_numbers<[1], [0], [0], [1], [0, 0, 1, 1], [], []>} : vector<32x128xbf16>, vector<128x24xbf16>, vector<32x24xf32> -> vector<32x24xf32>
    %37 = arith.addf %28, %36 : vector<32x24xf32>
    %c128_13 = arith.constant 128 : index
    %c0_14 = arith.constant 0 : index
    %38 = vector.load %arg0[%c128_13, %c0_14] : memref<160x1xi32, #tpu.memory_space<vmem>>, vector<32x1xi32>
    %39 = vector.broadcast %38 : vector<32x1xi32> to vector<32x128xi32>
    %40 = arith.cmpi eq, %39, %0 : vector<32x128xi32>
    %41 = arith.extui %40 : vector<32x128xi1> to vector<32x128xi32>
    %42 = arith.sitofp %41 : vector<32x128xi32> to vector<32x128xf32>
    %43 = arith.truncf %42 : vector<32x128xf32> to vector<32x128xbf16>
    %c512 = arith.constant 512 : index
    %c0_15 = arith.constant 0 : index
    %44 = vector.load %arg1[%c512, %c0_15] : memref<640x24xbf16, #tpu.memory_space<vmem>>, vector<128x24xbf16>
    %cst_16 = arith.constant dense<0.000000e+00> : vector<32x24xf32>
    %45 = tpu.matmul %43, %44, %cst_16 {dimension_numbers = #tpu.dot_dimension_numbers<[1], [0], [0], [1], [0, 0, 1, 1], [], []>} : vector<32x128xbf16>, vector<128x24xbf16>, vector<32x24xf32> -> vector<32x24xf32>
    %46 = arith.addf %37, %45 : vector<32x24xf32>
    %c0_17 = arith.constant 0 : index
    %c0_18 = arith.constant 0 : index
    %47 = vector.load %arg2[%c0_17, %c0_18] : memref<32x24xf32, #tpu.memory_space<vmem>>, vector<32x24xf32>
    %48 = arith.addf %46, %47 : vector<32x24xf32>
    %49 = vector.shape_cast %48 : vector<32x24xf32> to vector<2x16x24xf32>
    %cst_19 = arith.constant dense<0xFF800000> : vector<2x24xf32>
    %50 = vector.multi_reduction <maximumf>, %49, %cst_19 [1] : vector<2x16x24xf32> to vector<2x24xf32>
    %c0_20 = arith.constant 0 : index
    %c0_21 = arith.constant 0 : index
    %51 = vector.load %arg3[%c0_20, %c0_21] : memref<1x24xf32, #tpu.memory_space<vmem>>, vector<1x24xf32>
    %52 = vector.broadcast %51 : vector<1x24xf32> to vector<2x24xf32>
    %53 = arith.addf %50, %52 : vector<2x24xf32>
    %c0_22 = arith.constant 0 : index
    %c0_23 = arith.constant 0 : index
    %54 = vector.load %arg4[%c0_22, %c0_23] : memref<24x4xf32, #tpu.memory_space<vmem>>, vector<24x4xf32>
    %cst_24 = arith.constant dense<0.000000e+00> : vector<2x4xf32>
    %55 = tpu.matmul %53, %54, %cst_24 {dimension_numbers = #tpu.dot_dimension_numbers<[1], [0], [0], [1], [0, 0, 1, 1], [], []>} : vector<2x24xf32>, vector<24x4xf32>, vector<2x4xf32> -> vector<2x4xf32>
    %c0_25 = arith.constant 0 : index
    %c0_26 = arith.constant 0 : index
    %56 = vector.load %arg5[%c0_25, %c0_26] : memref<1x4xf32, #tpu.memory_space<vmem>>, vector<1x4xf32>
    %57 = vector.broadcast %56 : vector<1x4xf32> to vector<2x4xf32>
    %58 = arith.addf %55, %57 : vector<2x4xf32>
    %c0_27 = arith.constant 0 : index
    %c0_28 = arith.constant 0 : index
    %59 = vector.load %arg6[%c0_27, %c0_28] : memref<2x4xf32, #tpu.memory_space<vmem>>, vector<2x4xf32>
    tpu.vector_store %arg6[%c0_27, %c0_28], %58 {strides = array<i32>} : memref<2x4xf32, #tpu.memory_space<vmem>>, vector<2x4xf32>,
    return
  }
}

</mosaic_0001>

<bundles_post_ra>
// kernel: tpu_custom_call.1
= control target key start
LH: loop header
LB: loop body
LE: loop exit
PB: predicated region body
PF: predicated region fallthrough
CT: control target
= control target key end

     0   :  { %v1230_v2 = vmov 0   ;;  %s1527_s0 = inlined_call_operand.vmem [shape: s32[160,1], index: 0, kind: input, shape index: {}]   ;;  %s1528_s1 = inlined_call_operand.vmem [shape: bf16[640,24], index: 1, kind: input, shape index: {}]   ;;  %s1529_s2 = inlined_call_operand.vmem [shape: f32[32,24], index: 2, kind: input, shape index: {}]   ;;  %s1530_s3 = inlined_call_operand.vmem [shape: f32[1,24], index: 3, kind: input, shape index: {}]   ;;  %s1531_s4 = inlined_call_operand.vmem [shape: f32[24,4], index: 4, kind: input, shape index: {}]   ;;  %s1532_s5 = inlined_call_operand.vmem [shape: f32[1,4], index: 5, kind: input, shape index: {}]   ;;  %s1533_s6 = inlined_call_operand.hbm [shape: f32[2,4], index: 6, kind: output, shape index: {}]  }
   0x1   :  { %v315_v0 = vld [vmem:[%s1527_s0 + $0x50] sm:$0xff]  ;;  %v313_v1 = vld [vmem:[%s1527_s0 + $0x40] sm:$0xff]  ;;  %1165 = vset.pattern.permute.xlu1 %v1230_v2  ;;  %1164 = vset.pattern.permute.xlu0 %v1230_v2  ;;  %v316_v3 = vld [vmem:[%s1527_s0 + $0x58] sm:$0xff] }
   0x2   :  { %324 = vperm.xlu1 %1165, %v315_v0   ;;  %318 = vperm.xlu0 %1164, %v313_v1   ;;  %v314_v4 = vld [vmem:[%s1527_s0 + $0x48] sm:$0xff]  ;;  %v73_v6 = vld [vmem:[%s1527_s0 + $0x20] sm:$0xff]  ;;  %v1168_v12 = vld [vmem:[%s1528_s1 + $0x90] sm:$0xff]  }
   0x3   :  { %v74_v5 = vld [vmem:[%s1527_s0 + $0x28] sm:$0xff]  ;;  %v1166_v7 = vld [vmem:[%s1528_s1 + $0x80] sm:$0xff]   ;;  %v76_v14 = vld [vmem:[%s1527_s0 + $0x38] sm:$0xff] }
   0x4   :  { %v1167_v8 = vld [vmem:[%s1528_s1 + $0x88] sm:$0xff]   ;;  %v460_v10 = vld [vmem:[%s1527_s0 + $0x60] sm:$0xff]  ;;  %1070 = vmatprep.subr.bf16.mxu0 %v1166_v7  ;;  %v75_v15 = vld [vmem:[%s1527_s0 + $0x30] sm:$0xff] }
   0x5   :  { %v461_v9 = vld [vmem:[%s1527_s0 + $0x68] sm:$0xff]  ;;  %v1169_v11 = vld [vmem:[%s1528_s1 + $0x40] sm:$0xff]   ;;  %1071 = vmatpush3.bf16.msra.mxu0 %v1166_v7  ;;  %v1173_v16 = vld [vmem:[%s1528_s1 + $0x50] sm:$0xff]  }
   0x6   :  { %327 = vperm.xlu1 %1165, %v316_v3   ;;  %321 = vperm.xlu0 %1164, %v314_v4   ;;  %v1171_v13 = vld [vmem:[%s1528_s1 + $0x48] sm:$0xff]   ;;  %v1170_v17 = vld [vmem:[%s1528_s1 + $0x98] sm:$0xff]   ;;  %v462_v19 = vld [vmem:[%s1527_s0 + $0x70] sm:$0xff] }
   0x7   :  { %1072 = vmatprep.subr.bf16.mxu0 %v1167_v8  ;;  %1030 = vmatprep.subr.bf16.mxu1 %v1169_v11  ;;  %v463_v18 = vld [vmem:[%s1527_s0 + $0x78] sm:$0xff]  ;;  %v1172_v21 = vld [vmem:[%s1528_s1 + $0xa0] sm:$0xff]   ;;  %v28_v22 = vld [vmem:[%s1527_s0 + $0x8] sm:$0xff] }
   0x8   :  { %1031 = vmatpush3.bf16.msra.mxu1 %v1169_v11  ;;  %v1175_v20 = vld [vmem:[%s1528_s1 + $0x58] sm:$0xff]   ;;  %v27_v23 = vld [vmem:[%s1527_s0] sm:$0xff]  ;;  %v1174_v25 = vld [vmem:[%s1528_s1 + $0xa8] sm:$0xff]  }
   0x9   :  { %1073 = vmatpush3.bf16.msra.mxu0 %v1167_v8  ;;  %1032 = vmatprep.subr.bf16.mxu1 %v1171_v13  ;;  %v1177_v24 = vld [vmem:[%s1528_s1 + $0x60] sm:$0xff]   ;;  %v608_v26 = vld [vmem:[%s1527_s0 + $0x88] sm:$0xff]  ;;  %v1176_v29 = vld [vmem:[%s1528_s1 + $0xb0] sm:$0xff]  }
   0xa   :  { %81 = vperm.xlu1 %1165, %v74_v5   ;;  %78 = vperm.xlu0 %1164, %v73_v6   ;;  %v607_v27 = vld [vmem:[%s1527_s0 + $0x80] sm:$0xff]  ;;  %v1179_v28 = vld [vmem:[%s1528_s1 + $0x68] sm:$0xff]   ;;  %v30_v30 = vld [vmem:[%s1527_s0 + $0x18] sm:$0xff] }
   0xb   :  { %1074 = vmatprep.subr.bf16.mxu0 %v1168_v12  ;;  %v29_v31 = vld [vmem:[%s1527_s0 + $0x10] sm:$0xff]  ;;  %v1178_v33 = vld [vmem:[%s1528_s1 + $0xb8] sm:$0xff]   ;;  %v1180_v36 = vld [vmem:[%s1528_s1 + $0xc0] sm:$0xff]  }
   0xc   :  { %1033 = vmatpush3.bf16.msra.mxu1 %v1171_v13  ;;  %v1181_v32 = vld [vmem:[%s1528_s1 + $0x70] sm:$0xff]   ;;  %v610_v34 = vld [vmem:[%s1527_s0 + $0x98] sm:$0xff]  ;;  %v1185_v38 = vld [vmem:[%s1528_s1] sm:$0xff]  }
   0xd   :  { %1075 = vmatpush3.bf16.msra.mxu0 %v1168_v12  ;;  %1034 = vmatprep.subr.bf16.mxu1 %v1173_v16  ;;  %v609_v35 = vld [vmem:[%s1527_s0 + $0x90] sm:$0xff]  ;;  %v1183_v37 = vld [vmem:[%s1528_s1 + $0x78] sm:$0xff]  }
   0xe   :  { %468 = vperm.xlu1 %1165, %v461_v9   ;;  %465 = vperm.xlu0 %1164, %v460_v10  }
   0xf   :  { %1076 = vmatprep.subr.bf16.mxu0 %v1170_v17 }
  0x10   :  { %1035 = vmatpush3.bf16.msra.mxu1 %v1173_v16 }
  0x11   :  { %1077 = vmatpush3.bf16.msra.mxu0 %v1170_v17  ;;  %1036 = vmatprep.subr.bf16.mxu1 %v1175_v20 }
  0x12   :  { %87 = vperm.xlu1 %1165, %v76_v14   ;;  %84 = vperm.xlu0 %1164, %v75_v15  }
  0x13   :  { %1078 = vmatprep.subr.bf16.mxu0 %v1172_v21 }
  0x14   :  { %1037 = vmatpush3.bf16.msra.mxu1 %v1175_v20 }
  0x15   :  { %1079 = vmatpush3.bf16.msra.mxu0 %v1172_v21  ;;  %1038 = vmatprep.subr.bf16.mxu1 %v1177_v24 }
  0x16   :  { %474 = vperm.xlu1 %1165, %v463_v18   ;;  %471 = vperm.xlu0 %1164, %v462_v19  }
  0x17   :  { %1080 = vmatprep.subr.bf16.mxu0 %v1174_v25 }
  0x18   :  { %1039 = vmatpush3.bf16.msra.mxu1 %v1177_v24 }
  0x19   :  { %1081 = vmatpush3.bf16.msra.mxu0 %v1174_v25  ;;  %1040 = vmatprep.subr.bf16.mxu1 %v1179_v28 }
  0x1a   :  { %35 = vperm.xlu1 %1165, %v28_v22   ;;  %32 = vperm.xlu0 %1164, %v27_v23  }
  0x1b   :  { %1082 = vmatprep.subr.bf16.mxu0 %v1176_v29 }
  0x1c   :  { %1041 = vmatpush3.bf16.msra.mxu1 %v1179_v28 }
  0x1d   :  { %1083 = vmatpush3.bf16.msra.mxu0 %v1176_v29  ;;  %1042 = vmatprep.subr.bf16.mxu1 %v1181_v32 }
  0x1e   :  { %615 = vperm.xlu1 %1165, %v608_v26   ;;  %612 = vperm.xlu0 %1164, %v607_v27  }
  0x1f   :  { %1084 = vmatprep.subr.bf16.mxu0 %v1178_v33 }
  0x20   :  { %1043 = vmatpush3.bf16.msra.mxu1 %v1181_v32 }
  0x21   :  { %1085 = vmatpush3.bf16.msra.mxu0 %v1178_v33  ;;  %1044 = vmatprep.subr.bf16.mxu1 %v1183_v37 }
  0x22   :  { %41 = vperm.xlu1 %1165, %v30_v30   ;;  %38 = vperm.xlu0 %1164, %v29_v31  }
  0x23   :  { %1090 = vmatprep.subr.bf16.mxu0 %v1180_v36 }
  0x24   :  { %1045 = vmatpush3.bf16.msra.mxu1 %v1183_v37 }
  0x25   :  { %1050 = vmatprep.subr.bf16.mxu1 %v1185_v38 }
  0x26   :  { %621 = vperm.xlu1 %1165, %v610_v34   ;;  %618 = vperm.xlu0 %1164, %v609_v35  }
  0x27   :  { %11 = vsyncpa [#allocation3], 0  ;;  %v25_v39 = vlaneseq  ;;  %v1182_v45 = vld [vmem:[%s1528_s1 + $0xc8] sm:$0xff]   ;;  %v1231_v46 = vmov 1.0|1.0   ;;  %v1184_v49 = vld [vmem:[%s1528_s1 + $0xd0] sm:$0xff]  }
  0x28   :  { %v1186_v52 = vld [vmem:[%s1528_s1 + $0xd8] sm:$0xff]   ;;  %v1187_v55 = vld [vmem:[%s1528_s1 + $0x8] sm:$0xff]   ;;  %v1188_v56 = vld [vmem:[%s1528_s1 + $0xe0] sm:$0xff]   ;;  %v1232_v23 = vmov 0.0|0.0   ;;  %v1234_v24 = vmov 0.0   ;;  %s1235_s9 = smov [#allocation2]  }
  0x29   :  { %v1385_v42 = vand.u32 127, %v25_v39  ;;  %v1189_v59 = vld [vmem:[%s1528_s1 + $0x10] sm:$0xff]   ;;  %v1190_v60 = vld [vmem:[%s1528_s1 + $0xe8] sm:$0xff]   ;;  %v1191_v63 = vld [vmem:[%s1528_s1 + $0x18] sm:$0xff]   ;;  %s885_s10 = sshll.u32 %s1235_s9, 4  ;;  %s886_s10 = int_to_ptr.vmem [resolvable:$true] %s885_s10 }
  0x2a   :  { %v1192_v0 = vld [vmem:[%s1528_s1 + $0xf0] sm:$0xff]   ;;  %v1193_v1 = vld [vmem:[%s1528_s1 + $0x20] sm:$0xff]   ;;  %v1194_v2 = vld [vmem:[%s1528_s1 + $0xf8] sm:$0xff]   ;;  %p1211_p1 = scmp.lt.s32.totalorder %s886_s10, %s886_s10 }
  0x2b   :  { %v1195_v3 = vld [vmem:[%s1528_s1 + $0x28] sm:$0xff]   ;;  %v1196_v6 = vld [vmem:[%s1528_s1 + $0x100] sm:$0xff]   ;;  %v1197_v7 = vld [vmem:[%s1528_s1 + $0x30] sm:$0xff]  }
  0x2c   :  { %v1198_v8 = vld [vmem:[%s1528_s1 + $0x108] sm:$0xff]   ;;  %v1199_v9 = vld [vmem:[%s1528_s1 + $0x38] sm:$0xff]   ;;  %v1200_v10 = vld [vmem:[%s1528_s1 + $0x110] sm:$0xff]  }
  0x2d   :  { %v1201_v13 = vld [vmem:[%s1528_s1 + $0x118] sm:$0xff]   ;;  %v1202_v14 = vld [vmem:[%s1528_s1 + $0x120] sm:$0xff]   ;;  %v1203_v15 = vld [vmem:[%s1528_s1 + $0x128] sm:$0xff]  }
  0x2e   :  { %v1204_v16 = vld [vmem:[%s1528_s1 + $0x130] sm:$0xff]   ;;  %v1205_v17 = vld [vmem:[%s1528_s1 + $0x138] sm:$0xff]   ;;  %v790_v20 = vld [vmem:[%s1531_s4] sm:$0xff] }
  0x2f   :  { %v791_v21 = vld [vmem:[%s1531_s4 + $0x8] sm:$0xff]  ;;  %v792_v25 = vld [vmem:[%s1531_s4 + $0x10] sm:$0xff]  ;;  %v754_v34 = vld [vmem:[%s1529_s2] sm:$0xff] }
  0x30   :  { %v1140_v22 = vpack.c.bf16 %v791_v21, %v790_v20  ;;  %v756_v31 = vld [vmem:[%s1529_s2 + $0x10] sm:$0xff]  ;;  %v757_v37 = vld [vmem:[%s1529_s2 + $0x18] sm:$0xff] }
  0x81   :  { %v325_v40 = vpop.permute.xlu1 %324  ;;  %v319_v41 = vpop.permute.xlu0 %318 }
  0x82   :  { %vm331_vm0 = vcmp.eq.s32.totalorder %v325_v40, %v1385_v42  ;;  %vm329_vm3 = vcmp.eq.s32.totalorder %v319_v41, %v1385_v42  ;;  %v755_v41 = vld [vmem:[%s1529_s2 + $0x8] sm:$0xff] }
  0x85   :  { %v328_v43 = vpop.permute.xlu1 %327  ;;  %v322_v44 = vpop.permute.xlu0 %321 }
  0x86   :  { %vm332_vm1 = vcmp.eq.s32.totalorder %v328_v43, %v1385_v42  ;;  %vm330_vm2 = vcmp.eq.s32.totalorder %v322_v44, %v1385_v42 }
  0x87   :  { %vm939_vm4 = vmpackc.low %vm332_vm1, %vm331_vm0 }
  0x88   :  { %vm937_vm5 = vmpackc.low %vm330_vm2, %vm329_vm3 }
  0x89   :  { %1086 = vmatprep.mubr.msk.bf16.mxu0 %vm937_vm5, %v1231_v46  ;;  %v82_v47 = vpop.permute.xlu1 %81  ;;  %v79_v48 = vpop.permute.xlu0 %78 }
  0x8a   :  { %vm90_vm6 = vcmp.eq.s32.totalorder %v82_v47, %v1385_v42  ;;  %vm89_vm7 = vcmp.eq.s32.totalorder %v79_v48, %v1385_v42  ;;  %1087 = vmatmul.mubr.msk.bf16.vlgmr.msra.gmra.mrb[0].mxu0 %vm939_vm4, %v1231_v46 }
  0x8b   :  { %1091 = vmatpush3.bf16.msra.mxu0 %v1180_v36  ;;  %vm909_vm8 = vmpackc.low %vm90_vm6, %vm89_vm7 }
  0x8c   :  { %1046 = vmatprep.mubr.msk.bf16.mxu1 %vm909_vm8, %v1231_v46  ;;  %1092 = vmatprep.subr.bf16.mxu0 %v1182_v45 }
  0x8d   :  { %v469_v50 = vpop.permute.xlu1 %468  ;;  %v466_v51 = vpop.permute.xlu0 %465 }
  0x8e   :  { %vm477_vm9 = vcmp.eq.s32.totalorder %v469_v50, %v1385_v42  ;;  %vm476_vm10 = vcmp.eq.s32.totalorder %v466_v51, %v1385_v42 }
  0x8f   :  { %vm953_vm11 = vmpackc.low %vm477_vm9, %vm476_vm10  ;;  %1093 = vmatpush3.bf16.msra.mxu0 %v1182_v45 }
  0x90   :  { %1094 = vmatprep.subr.bf16.mxu0 %v1184_v49  ;;  %1106 = vmatprep.mubr.msk.bf16.mxu0 %vm953_vm11, %v1231_v46 }
  0x91   :  { %v88_v53 = vpop.permute.xlu1 %87  ;;  %v85_v54 = vpop.permute.xlu0 %84 }
  0x92   :  { %vm92_vm12 = vcmp.eq.s32.totalorder %v88_v53, %v1385_v42  ;;  %vm91_vm13 = vcmp.eq.s32.totalorder %v85_v54, %v1385_v42 }
  0x93   :  { %vm911_vm14 = vmpackc.low %vm92_vm12, %vm91_vm13  ;;  %1095 = vmatpush3.bf16.msra.mxu0 %v1184_v49 }
  0x94   :  { %1047 = vmatmul.mubr.msk.bf16.vlgmr.msra.gmra.mrb[0].mxu1 %vm911_vm14, %v1231_v46  ;;  %1096 = vmatprep.subr.bf16.mxu0 %v1186_v52  ;;  %vm1233_vm14 = vmmov 0  }
  0x95   :  { %1051 = vmatpush3.bf16.msra.mxu1 %v1185_v38  ;;  %v475_v57 = vpop.permute.xlu1 %474  ;;  %v472_v58 = vpop.permute.xlu0 %471 }
  0x96   :  { %1052 = vmatprep.subr.bf16.mxu1 %v1187_v55  ;;  %vm479_vm2 = vcmp.eq.s32.totalorder %v475_v57, %v1385_v42  ;;  %vm478_vm3 = vcmp.eq.s32.totalorder %v472_v58, %v1385_v42 }
  0x97   :  { %1097 = vmatpush3.bf16.msra.mxu0 %v1186_v52  ;;  %vm955_vm6 = vmpackc.low %vm479_vm2, %vm478_vm3 }
  0x98   :  { %1098 = vmatprep.subr.bf16.mxu0 %v1188_v56 }
  0x99   :  { %1053 = vmatpush3.bf16.msra.mxu1 %v1187_v55  ;;  %v36_v61 = vpop.permute.xlu1 %35  ;;  %v33_v62 = vpop.permute.xlu0 %32 }
  0x9a   :  { %vm44_vm15 = vcmp.eq.s32.totalorder %v36_v61, %v1385_v42  ;;  %vm43_vm0 = vcmp.eq.s32.totalorder %v33_v62, %v1385_v42  ;;  %1054 = vmatprep.subr.bf16.mxu1 %v1189_v59  ;;  %v973_v62 = vld [vmem:[%s1530_s3] ss:$0 sm:$0xff]  ;;  %s1206_s3 = scalar_lea.vmem %s886_s10, 32 }
  0x9b   :  { %vm921_vm1 = vmpackc.low %vm44_vm15, %vm43_vm0  ;;  %1099 = vmatpush3.bf16.msra.mxu0 %v1188_v56  ;;  %vm762_vm15 = vcmask 195584   ;;  %vm803_vm0 = vcmask 1041409   ;;  %p1207_p0 = scmp.ne.s32.totalorder %s886_s10, %s1206_s3  ;;  %p1212_p2 = scmp.lt.s32.totalorder %s1206_s3, %s1206_s3 }
  0x9c   :  { %1066 = vmatprep.mubr.msk.bf16.mxu1 %vm921_vm1, %v1231_v46  ;;  %1100 = vmatprep.subr.bf16.mxu0 %v1190_v60  ;;  %vm877_vm1 = vcmask 25600  }
  0x9d   :  { %1055 = vmatpush3.bf16.msra.mxu1 %v1189_v59  ;;  %v616_v4 = vpop.permute.xlu1 %615  ;;  %v613_v5 = vpop.permute.xlu0 %612  ;;  %p1213_p3 = por %p1212_p2, %p1211_p1 }
  0x9e   :  { %1056 = vmatprep.subr.bf16.mxu1 %v1191_v63  ;;  %vm624_vm4 = vcmp.eq.s32.totalorder %v616_v4, %v1385_v42  ;;  %vm623_vm5 = vcmp.eq.s32.totalorder %v613_v5, %v1385_v42  ;;  %v974_v5 = vld [vmem:[%s1532_s5] ss:$0 sm:$0xff] }
  0x9f   :  { %1101 = vmatpush3.bf16.msra.mxu0 %v1190_v60  ;;  %vm969_vm7 = vmpackc.low %vm624_vm4, %vm623_vm5  ;;  %p1214_p4 = pnand %p1213_p3, %p1207_p0 }
  0xa0   :  { %1102 = vmatprep.subr.bf16.mxu0 %v1192_v0 }
  0xa1   :  { %1057 = vmatpush3.bf16.msra.mxu1 %v1191_v63  ;;  %v42_v11 = vpop.permute.xlu1 %41  ;;  %v39_v12 = vpop.permute.xlu0 %38 }
  0xa2   :  { %1058 = vmatprep.subr.bf16.mxu1 %v1193_v1  ;;  %vm46_vm8 = vcmp.eq.s32.totalorder %v42_v11, %v1385_v42  ;;  %vm45_vm9 = vcmp.eq.s32.totalorder %v39_v12, %v1385_v42 }
  0xa3   :  { %1103 = vmatpush3.bf16.msra.mxu0 %v1192_v0  ;;  %vm923_vm10 = vmpackc.low %vm46_vm8, %vm45_vm9 }
  0xa4   :  { %1104 = vmatprep.subr.bf16.mxu0 %v1194_v2 }
  0xa5   :  { %1059 = vmatpush3.bf16.msra.mxu1 %v1193_v1  ;;  %v622_v18 = vpop.permute.xlu1 %621  ;;  %v619_v19 = vpop.permute.xlu0 %618 }
  0xa6   :  { %1060 = vmatprep.subr.bf16.mxu1 %v1195_v3  ;;  %vm626_vm11 = vcmp.eq.s32.totalorder %v622_v18, %v1385_v42  ;;  %vm625_vm12 = vcmp.eq.s32.totalorder %v619_v19, %v1385_v42 }
  0xa7   :  { %1105 = vmatpush3.bf16.msra.mxu0 %v1194_v2  ;;  %vm971_vm13 = vmpackc.low %vm626_vm11, %vm625_vm12 }
  0xa8   :  { %1110 = vmatprep.subr.bf16.mxu0 %v1196_v6 }
  0xa9   :  { %1061 = vmatpush3.bf16.msra.mxu1 %v1195_v3 }
  0xaa   :  { %1107 = vmatmul.mubr.msk.bf16.vlgmr.msra.gmra.mrb[0].mxu0 %vm955_vm6, %v1231_v46  ;;  %1062 = vmatprep.subr.bf16.mxu1 %v1197_v7 }
  0xab   :  { %1111 = vmatpush3.bf16.msra.mxu0 %v1196_v6  ;;  %1126 = vmatprep.mubr.msk.bf16.mxu0 %vm969_vm7, %v1231_v46 }
  0xac   :  { %1112 = vmatprep.subr.bf16.mxu0 %v1198_v8 }
  0xad   :  { %1063 = vmatpush3.bf16.msra.mxu1 %v1197_v7 }
  0xae   :  { %1064 = vmatprep.subr.bf16.mxu1 %v1199_v9 }
  0xaf   :  { %1113 = vmatpush3.bf16.msra.mxu0 %v1198_v8 }
  0xb0   :  { %1114 = vmatprep.subr.bf16.mxu0 %v1200_v10 }
  0xb1   :  { %1065 = vmatpush3.bf16.msra.mxu1 %v1199_v9 }
  0xb2   :  { %1139 = vmatprep.subr.bf16.mxu1 %v1232_v23 }
  0xb3   :  { %1115 = vmatpush3.bf16.msra.mxu0 %v1200_v10 }
  0xb4   :  { %1067 = vmatmul.mubr.msk.bf16.vlgmr.msra.gmra.mrb[0].mxu1 %vm923_vm10, %v1231_v46  ;;  %1116 = vmatprep.subr.bf16.mxu0 %v1201_v13 }
  0xb5   :  { %1141 = vmatpush3.bf16.msra.mxu1 %v1140_v22  ;;  %1136 = vmatprep.mubr.msk.f32.mxu1 %vm1233_vm14, %v1234_v24 }
  0xb6   :  { %1134 = vmatprep.subr.mxu1 %v1234_v24 }
  0xb7   :  { %1117 = vmatpush3.bf16.msra.mxu0 %v1201_v13 }
  0xb8   :  { %1118 = vmatprep.subr.bf16.mxu0 %v1202_v14 }
  0xb9   :  { %1135 = vmatpush3.msra.mxu1 %v792_v25 }
  0xbb   :  { %1119 = vmatpush3.bf16.msra.mxu0 %v1202_v14 }
  0xbc   :  { %1120 = vmatprep.subr.bf16.mxu0 %v1203_v15 }
  0xbf   :  { %1121 = vmatpush3.bf16.msra.mxu0 %v1203_v15 }
  0xc0   :  { %1122 = vmatprep.subr.bf16.mxu0 %v1204_v16 }
  0xc3   :  { %1123 = vmatpush3.bf16.msra.mxu0 %v1204_v16 }
  0xc4   :  { %1124 = vmatprep.subr.bf16.mxu0 %v1205_v17 }
  0xc7   :  { %1125 = vmatpush3.bf16.msra.mxu0 %v1205_v17 }
  0xca   :  { %1127 = vmatmul.mubr.msk.bf16.vlgmr.msra.gmra.mrb[0].mxu0 %vm971_vm13, %v1231_v46 }
 0x187   :  { %v1068_v26 = vpop.f32.mrb[0].mxu1 }
 0x188   :  { %v298_v27 = vpop.f32.mrb[1].mxu1 }
 0x189   :  { %v1069_v28 = vpop.f32.mrb[2].mxu1 }
 0x18a   :  { %v301_v29 = vpop.f32.mrb[3].mxu1 }
 0x19d   :  { %v1128_v30 = vpop.f32.mrb[0].mxu0 }
 0x19e   :  { %v1142_v32 = vadd.f32 %v1128_v30, %v1068_v26  ;;  %v735_v33 = vpop.f32.mrb[1].mxu0 }
 0x19f   :  { %v1143_v35 = vadd.f32 %v735_v33, %v298_v27  ;;  %v1129_v36 = vpop.f32.mrb[2].mxu0 }
 0x1a0   :  { %v760_v38 = vadd.f32 %v1142_v32, %v756_v31  ;;  %v1144_v39 = vadd.f32 %v1129_v36, %v1069_v28  ;;  %v738_v40 = vpop.f32.mrb[3].mxu0 }
 0x1a1   :  { %v758_v42 = vadd.f32 %v1143_v35, %v754_v34  ;;  %v1145_v43 = vadd.f32 %v738_v40, %v301_v29 }
 0x1a2   :  { %v761_v44 = vadd.f32 %v1144_v39, %v757_v37  ;;  %v772_v46 = vsel %vm762_vm15, %v760_v38, -inf }
 0x1a3   :  { %v759_v45 = vadd.f32 %v1145_v43, %v755_v41  ;;  %v763_v48 = vsel %vm762_vm15, %v758_v42, -inf }
 0x1a4   :  { %v773_v47 = vsel %vm762_vm15, %v761_v44, -inf }
 0x1a5   :  { %v774_v49 = vmax.f32 %v772_v46, %v773_v47  ;;  %v764_v50 = vsel %vm762_vm15, %v759_v45, -inf }
 0x1a6   :  { %v765_v51 = vmax.f32 %v763_v48, %v764_v50 }
 0x1a7   :  { %v775_v52 = vrot.slane %v774_v49, 4 }
 0x1a8   :  { %v766_v53 = vrot.slane %v765_v51, 4 }
 0x1a9   :  { %v776_v54 = vmax.f32 %v774_v49, %v775_v52 }
 0x1aa   :  { %v767_v55 = vmax.f32 %v765_v51, %v766_v53 }
 0x1ab   :  { %v777_v56 = vrot.slane %v776_v54, 2 }
 0x1ac   :  { %v768_v57 = vrot.slane %v767_v55, 2 }
 0x1ad   :  { %v778_v58 = vmax.f32 %v776_v54, %v777_v56 }
 0x1ae   :  { %v769_v59 = vmax.f32 %v767_v55, %v768_v57 }
 0x1af   :  { %v779_v60 = vrot.slane %v778_v58, 1 }
 0x1b0   :  { %v770_v61 = vrot.slane %v769_v59, 1 }
 0x1b1   :  { %v780_v63 = vmax.f32 %v778_v58, %v779_v60 }
 0x1b2   :  { %v771_v0 = vmax.f32 %v769_v59, %v770_v61 }
 0x1b3   :  { %v789_v1 = vadd.f32 %v973_v62, %v780_v63 }
 0x1b4   :  { %v788_v2 = vadd.f32 %v973_v62, %v771_v0 }
 0x1b5   :  { %v802_v3 = vrot.slane %v789_v1, 7 }
 0x1b7   :  { %v804_v4 = vsel %vm803_vm0, %v802_v3, %v788_v2 }
 0x1b8   :  { %1137 = vmatmul.mubr.msk.f32.vlgmr.msra.gmra.mrb[4].mxu1 %vm762_vm15, %v804_v4 }
 0x28b   :  { %v873_v6 = vpop.f32.mrb[4].mxu1 }
 0x28c   :  { %v874_v7 = vadd.f32 %v974_v5, %v873_v6  ;;  %v1138_v8 = vpop.f32.mrb[5].mxu1 }
 0x28e   :  { %878 = vst.msk [vmem:[#allocation2] sm:$0x3] %vm877_vm1, %v874_v7 }
 0x28f   :  { %1217 = shalt.err (!%p1214_p4)
}
 0x290   :  { %s1218_s13 = scalar_lea.hbm %s1533_s6, 32 }
 0x291   :  { %p1219_p5 = scmp.ne.s32.totalorder %s1533_s6, %s1218_s13  ;;  %p1222_p6 = scmp.lt.u32.totalorder %s1218_s13, %s1533_s6 }
 0x293   :  { %p1224_p7 = pnand %p1222_p6, %p1219_p5 }
 0x295   :  { %1227 = shalt.err (!%p1224_p7)
}
 0x296   :  { %888 = dma.vmem_to_hbm [thread:$0]  %s886_s10, 32, %s1533_s6, [#allocation3]  }
 0x297   :  { %1228 = dma.done.wait [#allocation3], 32  }
 0x298   :  { %1229 = vsyncadd [#allocation3], 4294967264 }
 0x299   :  { %892 = vsyncpa [#allocation3], 1 }

</bundles_post_ra>
